<compile_context>
chip_gen: v7x
topology: tpu7x:2x2x1
jax: 0.10.0
libtpu: 0.0.40
codegen_flags: <defaults>
</compile_context>

<pallas_src>
from functools import partial

import jax
import jax.numpy as jnp
from jax.experimental import pallas as pl
from jax.experimental.pallas import tpu as pltpu


# ------------------------- FP4 (E2M1) fake quantization ------------------------- #
_FP4_LEVELS = jnp.array([0.0, 0.5, 1.0, 1.5, 2.0, 3.0, 4.0, 6.0], dtype=jnp.float32)


def quantize_fp4_levels(w):
    """Round-to-nearest FP4 E2M1: returns (levels, per-tensor scale).

    levels * scale == the fake-quantized f32 weight of the reference model.
    """
    w = w.astype(jnp.float32)
    scale = jnp.max(jnp.abs(w)) / 6.0
    scale = jnp.where(scale == 0.0, 1.0, scale)
    ws = w / scale
    sign = jnp.sign(ws)
    mag = jnp.abs(ws)
    idx = jnp.argmin(jnp.abs(mag[..., None] - _FP4_LEVELS), axis=-1)
    return _FP4_LEVELS[idx] * sign, scale


def quantize_fp4(w):
    """Reference semantics: fake-quantized f32 weight (levels * scale)."""
    q, s = quantize_fp4_levels(w)
    return q * s


# ------------------------------- padding helpers -------------------------------- #
def _round_up(n, m):
    return ((n + m - 1) // m) * m


def _pad_axis(a, target, axis):
    pad = target - a.shape[axis]
    if pad <= 0:
        return a
    widths = [(0, 0)] * a.ndim
    widths[axis] = (0, pad)
    return jnp.pad(a, widths)


# ------------------------- one-time parameter preparation ------------------------ #
def prepare_fp4_params(w1, b1, w2, b2, lane=128):
    """Quantize (once), transpose to (in, out) layout.

    Only the FINAL output feature dim is lane-padded to 128 (lane-dense output
    store). Contraction dims (in_features, hidden) keep their natural extents.
    E2M1 levels are exactly representable in bf16 -> lossless narrow storage.

    w1: (hidden, in), b1: (hidden,), w2: (out, hidden), b2: (out,).
    """
    hid_f, in_f = w1.shape
    out_f, _ = w2.shape
    out_p = _round_up(out_f, lane)

    q1, s1 = quantize_fp4_levels(w1)          # levels, f32 scale
    q2, s2 = quantize_fp4_levels(w2)

    w1_t = q1.T.astype(jnp.bfloat16)                                    # (in_f, hid_f)
    w2_t = _pad_axis(q2.T, out_p, 1).astype(jnp.bfloat16)               # (hid_f, out_p)
    b1_p = b1.reshape(1, hid_f).astype(jnp.float32)                     # (1, hid_f)
    b2_p = _pad_axis(b2.reshape(1, out_f).astype(jnp.float32), out_p, 1)  # (1, out_p)
    scales = jnp.stack([s1, s2]).astype(jnp.float32)                    # (2,)

    return {"w1": w1_t, "b1": b1_p, "w2": w2_t, "b2": b2_p, "scales": scales}


# --------------------------------- Pallas kernel --------------------------------- #
def _mlp_kernel(scales_ref, x_ref, w1_ref, b1_ref, w2_ref, b2_ref, o_ref):
    # fc1: (x @ W1_levels) * s1 + b1  ->  ReLU  ->  fc2: (h @ W2_levels) * s2 + b2
    s1 = scales_ref[0]
    s2 = scales_ref[1]

    # bf16 x bf16 -> f32 accumulate: native single-pass MXU on v5e/v6e/v7x.
    x = x_ref[...].astype(jnp.bfloat16)
    h = jnp.dot(x, w1_ref[...], preferred_element_type=jnp.float32) * s1 + b1_ref[...]
    h = jnp.maximum(h, 0.0)

    y = (jnp.dot(h.astype(jnp.bfloat16), w2_ref[...],
                 preferred_element_type=jnp.float32) * s2 + b2_ref[...])
    o_ref[...] = y  # lane-dense (out_p multiple of 128) unmasked store


# ----------------------------------- forward ------------------------------------- #
@partial(jax.jit, static_argnames=("out_features",))
def simple_fp4_forward(x, params, *, out_features):
    """x: (B, in_features) f32.  params from prepare_fp4_params."""
    w1p, b1p = params["w1"], params["b1"]
    w2p, b2p = params["w2"], params["b2"]
    scales = params["scales"]

    out_p = w2p.shape[1]

    B, _ = x.shape
    B_pad = _round_up(B, 8)
    x32 = _pad_axis(x.astype(jnp.float32), B_pad, 0)   # single pad, only if needed

    out = pl.pallas_call(
        _mlp_kernel,
        out_shape=jax.ShapeDtypeStruct((B_pad, out_p), jnp.float32),
        in_specs=[
            pl.BlockSpec(memory_space=pltpu.MemorySpace.SMEM),   # scales (2,)
            pl.BlockSpec(memory_space=pltpu.MemorySpace.VMEM),   # x      (B_pad, in_f)
            pl.BlockSpec(memory_space=pltpu.MemorySpace.VMEM),   # w1     (in_f, hid_f) bf16
            pl.BlockSpec(memory_space=pltpu.MemorySpace.VMEM),   # b1     (1, hid_f)
            pl.BlockSpec(memory_space=pltpu.MemorySpace.VMEM),   # w2     (hid_f, out_p) bf16
            pl.BlockSpec(memory_space=pltpu.MemorySpace.VMEM),   # b2     (1, out_p)
        ],
        out_specs=pl.BlockSpec(memory_space=pltpu.MemorySpace.VMEM),
    )(scales, x32, w1p, b1p, w2p, b2p)

    return out[:B, :out_features]


# ------------------------------------ main ---------------------------------------- #
if __name__ == "__main__":
    B, IN_F, HID_F, OUT_F = 8, 32, 64, 16

    key = jax.random.PRNGKey(0)
    kx, kw1, kb1, kw2, kb2 = jax.random.split(key, 5)

    x = jax.random.normal(kx, (B, IN_F), dtype=jnp.float32)
    # nn.Linear-style deterministic init (uniform in +-1/sqrt(fan_in))
    w1 = jax.random.uniform(kw1, (HID_F, IN_F), minval=-1.0, maxval=1.0) / jnp.sqrt(IN_F)
    b1 = jax.random.uniform(kb1, (HID_F,), minval=-1.0, maxval=1.0) / jnp.sqrt(IN_F)
    w2 = jax.random.uniform(kw2, (OUT_F, HID_F), minval=-1.0, maxval=1.0) / jnp.sqrt(HID_F)
    b2 = jax.random.uniform(kb2, (OUT_F,), minval=-1.0, maxval=1.0) / jnp.sqrt(HID_F)

    # One-time parameter setup (quantize + transpose + pad) -- off the hot path.
    params = prepare_fp4_params(w1, b1, w2, b2)
    params = jax.tree_util.tree_map(jax.block_until_ready, params)

    y = simple_fp4_forward(x, params, out_features=OUT_F)
    jax.block_until_ready(y)

    # Pure-JAX f32 reference with original FP4Linear semantics (scale folded into W).
    # Tolerance loosened to 1e-2 because the kernel runs bf16 activations on the MXU.
    h_ref = jnp.maximum(x @ quantize_fp4(w1).T + b1, 0.0)
    y_ref = h_ref @ quantize_fp4(w2).T + b2
    assert y.shape == (B, OUT_F)
    assert jnp.allclose(y, y_ref, atol=1e-2, rtol=1e-2), float(jnp.max(jnp.abs(y - y_ref)))

    print("KERNEL_OK")
</pallas_src>

<mosaic_0001>
module attributes {stable_mosaic.version = 11 : i64} {
  func.func @_mlp_kernel(%arg0: memref<2xf32, #tpu.memory_space<smem>>, %arg1: memref<8x32xf32, #tpu.memory_space<vmem>>, %arg2: memref<32x64xbf16, #tpu.memory_space<vmem>>, %arg3: memref<1x64xf32, #tpu.memory_space<vmem>>, %arg4: memref<64x128xbf16, #tpu.memory_space<vmem>>, %arg5: memref<1x128xf32, #tpu.memory_space<vmem>>, %arg6: memref<8x128xf32, #tpu.memory_space<vmem>>) attributes {dimension_semantics = [], scalar_prefetch = 0 : i64, scratch_operands = 0 : i64, tpu.core_type = #tpu.core_type<tc>} {
    %c0 = arith.constant 0 : index
    %0 = memref.load %arg0[%c0] : memref<2xf32, #tpu.memory_space<smem>>
    %c1 = arith.constant 1 : index
    %1 = memref.load %arg0[%c1] : memref<2xf32, #tpu.memory_space<smem>>
    %c0_0 = arith.constant 0 : index
    %c0_1 = arith.constant 0 : index
    %2 = vector.load %arg1[%c0_0, %c0_1] : memref<8x32xf32, #tpu.memory_space<vmem>>, vector<8x32xf32>
    %3 = arith.truncf %2 : vector<8x32xf32> to vector<8x32xbf16>
    %c0_2 = arith.constant 0 : index
    %c0_3 = arith.constant 0 : index
    %4 = vector.load %arg2[%c0_2, %c0_3] : memref<32x64xbf16, #tpu.memory_space<vmem>>, vector<32x64xbf16>
    %cst = arith.constant dense<0.000000e+00> : vector<8x64xf32>
    %5 = tpu.matmul %3, %4, %cst {dimension_numbers = #tpu.dot_dimension_numbers<[1], [0], [0], [1], [0, 0, 1, 1], [], []>} : vector<8x32xbf16>, vector<32x64xbf16>, vector<8x64xf32> -> vector<8x64xf32>
    %6 = vector.broadcast %0 : f32 to vector<8x64xf32>
    %7 = arith.mulf %5, %6 : vector<8x64xf32>
    %c0_4 = arith.constant 0 : index
    %c0_5 = arith.constant 0 : index
    %8 = vector.load %arg3[%c0_4, %c0_5] : memref<1x64xf32, #tpu.memory_space<vmem>>, vector<1x64xf32>
    %9 = vector.broadcast %8 : vector<1x64xf32> to vector<8x64xf32>
    %10 = arith.addf %7, %9 : vector<8x64xf32>
    %cst_6 = arith.constant 0.000000e+00 : f32
    %11 = vector.broadcast %cst_6 : f32 to vector<8x64xf32>
    %12 = arith.maximumf %10, %11 : vector<8x64xf32>
    %13 = arith.truncf %12 : vector<8x64xf32> to vector<8x64xbf16>
    %c0_7 = arith.constant 0 : index
    %c0_8 = arith.constant 0 : index
    %14 = vector.load %arg4[%c0_7, %c0_8] : memref<64x128xbf16, #tpu.memory_space<vmem>>, vector<64x128xbf16>
    %cst_9 = arith.constant dense<0.000000e+00> : vector<8x128xf32>
    %15 = tpu.matmul %13, %14, %cst_9 {dimension_numbers = #tpu.dot_dimension_numbers<[1], [0], [0], [1], [0, 0, 1, 1], [], []>} : vector<8x64xbf16>, vector<64x128xbf16>, vector<8x128xf32> -> vector<8x128xf32>
    %16 = vector.broadcast %1 : f32 to vector<8x128xf32>
    %17 = arith.mulf %15, %16 : vector<8x128xf32>
    %c0_10 = arith.constant 0 : index
    %c0_11 = arith.constant 0 : index
    %18 = vector.load %arg5[%c0_10, %c0_11] : memref<1x128xf32, #tpu.memory_space<vmem>>, vector<1x128xf32>
    %19 = vector.broadcast %18 : vector<1x128xf32> to vector<8x128xf32>
    %20 = arith.addf %17, %19 : vector<8x128xf32>
    %c0_12 = arith.constant 0 : index
    %c0_13 = arith.constant 0 : index
    %21 = vector.load %arg6[%c0_12, %c0_13] : memref<8x128xf32, #tpu.memory_space<vmem>>, vector<8x128xf32>
    tpu.vector_store %arg6[%c0_12, %c0_13], %20 {strides = array<i32>} : memref<8x128xf32, #tpu.memory_space<vmem>>, vector<8x128xf32>,
    return
  }
}

</mosaic_0001>

<bundles_post_ra>
// kernel: simple_fp4_forward.1
= control target key start
LH: loop header
LB: loop body
LE: loop exit
PB: predicated region body
PF: predicated region fallthrough
CT: control target
= control target key end

     0   :  { %11 = vsyncpa [#allocation5], 0  ;;  %s533_s0 = inlined_call_operand.vmem [shape: f32[2], index: 0, kind: input, shape index: {}]   ;;  %s534_s1 = inlined_call_operand.hbm [shape: f32[8,32], index: 1, kind: input, shape index: {}]   ;;  %s535_s2 = inlined_call_operand.hbm [shape: bf16[32,64], index: 2, kind: input, shape index: {}]   ;;  %s536_s3 = inlined_call_operand.vmem [shape: f32[1,64], index: 3, kind: input, shape index: {}]   ;;  %s537_s4 = inlined_call_operand.hbm [shape: bf16[64,128], index: 4, kind: input, shape index: {}]   ;;  %s538_s5 = inlined_call_operand.vmem [shape: f32[1,128], index: 5, kind: input, shape index: {}]   ;;  %s539_s6 = inlined_call_operand.hbm [shape: f32[8,128], index: 6, kind: output, shape index: {}]  }
   0x1   :  { %12 = vsyncpa [#allocation3], 0 }
   0x2   :  { %13 = vsyncpa [#allocation8], 0 }
   0x3   :  { %14 = vsyncpa [#allocation4], 0  ;;  %s419_s21 = smov [#allocation7]   ;;  %s21_s25 = sshll.u32 %s533_s0, 4  ;;  %s22_s25 = int_to_ptr.vmem [resolvable:$true] %s21_s25 }
   0x4   :  { %s40_s22 = sshll.u32 %s419_s21, 4  ;;  %s311_s28 = scalar_lea.hbm %s535_s2, 256  ;;  %s41_s22 = int_to_ptr.vmem [resolvable:$true] %s40_s22 }
   0x5   :  { %p312_p0 = scmp.ne.s32.totalorder %s535_s2, %s311_s28  ;;  %p315_p1 = scmp.lt.u32.totalorder %s311_s28, %s535_s2 }
   0x7   :  { %p317_p2 = pnand %p315_p1, %p312_p0 }
   0x9   :  { %320 = shalt.err (!%p317_p2)
}
   0xa   :  { %s321_s9 = scalar_lea.vmem %s41_s22, 256  ;;  %p326_p4 = scmp.lt.s32.totalorder %s41_s22, %s41_s22 }
   0xb   :  { %p322_p3 = scmp.ne.s32.totalorder %s41_s22, %s321_s9  ;;  %p327_p5 = scmp.lt.s32.totalorder %s321_s9, %s321_s9 }
   0xd   :  { %p328_p6 = por %p327_p5, %p326_p4 }
   0xf   :  { %p329_p7 = pnand %p328_p6, %p322_p3 }
  0x11   :  { %332 = shalt.err (!%p329_p7)
}
  0x12   :  { %s420_s0 = smov 64   ;;  %s421_s10 = smov 4  }
  0x13   :  { %46 = dma.hbm_to_vmem [thread:$0]  %s535_s2, 256, %s41_s22, [#allocation8], %s420_s0, %s420_s0, %s421_s10  }
  0x14   :  { %s333_s13 = scalar_lea.vmem %s22_s25, 16  ;;  %p338_p9 = scmp.lt.s32.totalorder %s22_s25, %s22_s25 }
  0x15   :  { %p334_p8 = scmp.ne.s32.totalorder %s22_s25, %s333_s13  ;;  %p339_p10 = scmp.lt.s32.totalorder %s333_s13, %s333_s13 }
  0x17   :  { %p340_p11 = por %p339_p10, %p338_p9 }
  0x19   :  { %p341_p12 = pnand %p340_p11, %p334_p8 }
  0x1b   :  { %344 = shalt.err (!%p341_p12)
}
  0x1c   :  { %s422_s14 = smov [#allocation2]   ;;  %s423_s15 = smov [#allocation6]  }
  0x1d   :  { %24 = dma.vmem_to_smem %s22_s25, 16, %s422_s14, [#allocation5]  }
  0x1e   :  { %s31_s16 = sshll.u32 %s423_s15, 4  ;;  %s424_s17 = smov [#allocation9]   ;;  %s32_s16 = int_to_ptr.vmem [resolvable:$true] %s31_s16 }
  0x1f   :  { %s54_s18 = sshll.u32 %s424_s17, 4  ;;  %s345_s2 = scalar_lea.hbm %s534_s1, 128  ;;  %s481_s18 = int_to_ptr.vmem [resolvable:$true] %s54_s18 }
  0x20   :  { %p346_p13 = scmp.ne.s32.totalorder %s534_s1, %s345_s2  ;;  %p349_p0 = scmp.lt.u32.totalorder %s345_s2, %s534_s1 }
  0x22   :  { %p351_p1 = pnand %p349_p0, %p346_p13 }
  0x24   :  { %354 = shalt.err (!%p351_p1)
}
  0x25   :  { %s355_s25 = scalar_lea.vmem %s32_s16, 128  ;;  %p360_p3 = scmp.lt.s32.totalorder %s32_s16, %s32_s16 }
  0x26   :  { %p356_p2 = scmp.ne.s32.totalorder %s32_s16, %s355_s25  ;;  %p361_p4 = scmp.lt.s32.totalorder %s355_s25, %s355_s25 }
  0x28   :  { %p362_p5 = por %p361_p4, %p360_p3 }
  0x2a   :  { %p363_p6 = pnand %p362_p5, %p356_p2 }
  0x2c   :  { %366 = shalt.err (!%p363_p6)
}
  0x2d   :  { %34 = dma.hbm_to_vmem [thread:$0]  %s534_s1, 128, %s32_s16, [#allocation3]  }
  0x2e   :  { %s367_s30 = scalar_lea.hbm %s537_s4, 512 }
  0x2f   :  { %p368_p7 = scmp.ne.s32.totalorder %s537_s4, %s367_s30  ;;  %p371_p8 = scmp.lt.u32.totalorder %s367_s30, %s537_s4 }
  0x31   :  { %p373_p9 = pnand %p371_p8, %p368_p7 }
  0x33   :  { %376 = shalt.err (!%p373_p9)
}
  0x34   :  { %s377_s12 = scalar_lea.vmem %s481_s18, 512  ;;  %p382_p11 = scmp.lt.s32.totalorder %s481_s18, %s481_s18 }
  0x35   :  { %p378_p10 = scmp.ne.s32.totalorder %s481_s18, %s377_s12  ;;  %p383_p12 = scmp.lt.s32.totalorder %s377_s12, %s377_s12 }
  0x37   :  { %p384_p13 = por %p383_p12, %p382_p11 }
  0x39   :  { %p385_p0 = pnand %p384_p13, %p378_p10 }
  0x3b   :  { %388 = shalt.err (!%p385_p0)
}
  0x3c   :  { %60 = dma.hbm_to_vmem [thread:$0]  %s537_s4, 512, %s481_s18, [#allocation8], %s420_s0, %s420_s0, %s421_s10  }
  0x3d   :  { %411 = dma.done.wait [#allocation5], 16  }
  0x3e   :  { %412 = vsyncadd [#allocation5], 4294967280 }
  0x3f   :  { %413 = dma.done.wait [#allocation3], 128  }
  0x40   :  { %414 = vsyncadd [#allocation3], 4294967168 }
  0x41   :  { %415 = dma.done.wait [#allocation8], 768  }
  0x42   :  { %416 = vsyncadd [#allocation8], 4294966528 }
  0x43   :  { %75 = sfence }
  0x44   :  { %v305_v0 = vld [vmem:[#allocation7] sm:$0xff]   ;;  %v425_v1 = vmov 0.0   ;;  %v306_v2 = vld [vmem:[#allocation7 + $0x8] sm:$0xff]   ;;  %vm426_vm0 = vmmov 0   ;;  %v79_v3 = vld [vmem:[#allocation6] sm:$0xff]  ;;  %vm97_vm1 = vcmask 261120  }
  0x45   :  { %276 = vmatprep.subr.bf16.mxu0 %v425_v1  ;;  %284 = vmatprep.subr.bf16.mxu1 %v425_v1  ;;  %v307_v4 = vld [vmem:[#allocation9] sm:$0xff]   ;;  %v308_v5 = vld [vmem:[#allocation9 + $0x8] sm:$0xff]   ;;  %v80_v6 = vpack.c.bf16 %v79_v3, %v79_v3  ;;  %v309_v7 = vld [vmem:[#allocation9 + $0x10] sm:$0xff]   ;;  %s77_s4 = sld [smem:[#allocation2]]  ;;  %vm185_vm2 = vcmask 523264   ;;  %s257_s14 = sld [smem:[#allocation2 + $0x1]] }
  0x46   :  { %277 = vmatpush3.bf16.msra.mxu0 %v305_v0  ;;  %280 = vmatprep.mubr.msk.bf16.mxu0 %vm426_vm0, %v425_v1  ;;  %v310_v8 = vld [vmem:[#allocation9 + $0x18] sm:$0xff]   ;;  %v261_v11 = vld [vmem:[%s536_s3] ss:$0 sm:$0xff]  ;;  %s427_s17 = smov [#allocation10]  }
  0x47   :  { %278 = vmatprep.subr.bf16.mxu0 %v425_v1  ;;  %292 = vmatprep.mubr.msk.bf16.mxu1 %vm426_vm0, %v425_v1  ;;  %v267_v21 = vld [vmem:[%s538_s5] ss:$0 sm:$0xff]  ;;  %s246_s18 = sshll.u32 %s427_s17, 4  ;;  %s247_s18 = int_to_ptr.vmem [resolvable:$true] %s246_s18 }
  0x48   :  { %285 = vmatpush3.bf16.msra.mxu1 %v307_v4  ;;  %s389_s3 = scalar_lea.vmem %s247_s18, 128  ;;  %p394_p2 = scmp.lt.s32.totalorder %s247_s18, %s247_s18 }
  0x49   :  { %286 = vmatprep.subr.bf16.mxu1 %v425_v1  ;;  %p390_p1 = scmp.ne.s32.totalorder %s247_s18, %s389_s3  ;;  %p395_p3 = scmp.lt.s32.totalorder %s389_s3, %s389_s3 }
  0x4a   :  { %279 = vmatpush3.bf16.msra.mxu0 %v306_v2 }
  0x4b   :  { %v141_v9 = vstv %s77_s4  ;;  %v229_v19 = vstv %s257_s14  ;;  %p396_p4 = por %p395_p3, %p394_p2 }
  0x4c   :  { %287 = vmatpush3.bf16.msra.mxu1 %v308_v5 }
  0x4d   :  { %281 = vmatmul.mubr.msk.bf16.vlgmr.msra.gmra.mrb[0].mxu0 %vm97_vm1, %v80_v6  ;;  %288 = vmatprep.subr.bf16.mxu1 %v425_v1  ;;  %p397_p5 = pnand %p396_p4, %p390_p1 }
  0x50   :  { %289 = vmatpush3.bf16.msra.mxu1 %v309_v7 }
  0x51   :  { %290 = vmatprep.subr.bf16.mxu1 %v425_v1 }
  0x54   :  { %291 = vmatpush3.bf16.msra.mxu1 %v310_v8 }
 0x120   :  { %v135_v10 = vpop.f32.mrb[0].mxu0 }
 0x121   :  { %v142_v12 = vmul.f32 %v141_v9, %v135_v10  ;;  %v282_v13 = vpop.f32.mrb[1].mxu0 }
 0x122   :  { %v138_v14 = vpop.f32.mrb[2].mxu0 }
 0x123   :  { %v150_v15 = vadd.f32 %v261_v11, %v142_v12  ;;  %v283_v16 = vpop.f32.mrb[3].mxu0 }
 0x125   :  { %v151_v17 = vmax.f32 %v150_v15, 0.0 }
 0x127   :  { %v152_v18 = vpack.c.bf16 %v151_v17, %v151_v17 }
 0x129   :  { %293 = vmatmul.mubr.msk.bf16.vlgmr.msra.gmra.mrb[0].mxu1 %vm185_vm2, %v152_v18 }
 0x1fc   :  { %v223_v20 = vpop.f32.mrb[0].mxu1 }
 0x1fd   :  { %v230_v22 = vmul.f32 %v229_v19, %v223_v20  ;;  %v294_v23 = vpop.f32.mrb[1].mxu1 }
 0x1fe   :  { %v226_v24 = vpop.f32.mrb[2].mxu1 }
 0x1ff   :  { %v295_v25 = vpop.f32.mrb[3].mxu1  ;;  %v238_v26 = vadd.f32 %v267_v21, %v230_v22 }
 0x201   :  { %239 = vst [vmem:[#allocation10] sm:$0xff] %v238_v26 }
 0x202   :  { %400 = shalt.err (!%p397_p5)
}
 0x203   :  { %s401_s5 = scalar_lea.hbm %s539_s6, 128 }
 0x204   :  { %p402_p6 = scmp.ne.s32.totalorder %s539_s6, %s401_s5  ;;  %p405_p7 = scmp.lt.u32.totalorder %s401_s5, %s539_s6 }
 0x206   :  { %p407_p8 = pnand %p405_p7, %p402_p6 }
 0x208   :  { %410 = shalt.err (!%p407_p8)
}
 0x209   :  { %249 = dma.vmem_to_hbm [thread:$0]  %s247_s18, 128, %s539_s6, [#allocation4]  }
 0x20a   :  { %417 = dma.done.wait [#allocation4], 128  }
 0x20b   :  { %418 = vsyncadd [#allocation4], 4294967168 }
 0x20c   :  { %253 = vsyncpa [#allocation3], 1 }
 0x20d   :  { %254 = vsyncpa [#allocation8], 1 }
 0x20e   :  { %255 = vsyncpa [#allocation4], 1 }
 0x20f   :  { %256 = vsyncpa [#allocation5], 1 }

</bundles_post_ra>
